<compile_context>
chip_gen: v6e
topology: v6e:2x2x1
jax: 0.10.0
libtpu: 0.0.40
codegen_flags: <defaults>
</compile_context>

<pallas_src>
import jax
import jax.numpy as jnp
from jax.experimental import pallas as pl
from jax.experimental.pallas import tpu as pltpu

LN_EPS = 1e-5
HIDDEN = 64


def _round_up(n, m):
    return ((n + m - 1) // m) * m


def _layernorm(h, gamma, beta):
    # One-pass variance: E[h^2] - mean^2 -> the two lane reduces are
    # independent (overlap on the XLU) and the (h - mean)^2 pass disappears.
    mean = jnp.mean(h, axis=-1, keepdims=True)
    mean_sq = jnp.mean(h * h, axis=-1, keepdims=True)
    var = jnp.maximum(mean_sq - mean * mean, 0.0)
    return (h - mean) * jax.lax.rsqrt(var + LN_EPS) * gamma + beta


def critic_kernel(x_ref, u_ref,
                  w1_ref, b1_ref, g1_ref, be1_ref,
                  w2x_ref, w2u_ref, b2_ref, g2_ref, be2_ref,
                  w3_ref, b3_ref,
                  out_ref):
    x = x_ref[...]          # (TILE_B, state_dim)  bf16
    u = u_ref[...]          # (TILE_B, action_dim) bf16

    # --- layer 1: Linear + ReLU + LayerNorm (bf16 MXU dot, f32 accum/LN) ----
    h1 = jnp.dot(x, w1_ref[...], preferred_element_type=jnp.float32) + b1_ref[...]
    h1 = jnp.maximum(h1, 0.0)
    h1 = _layernorm(h1, g1_ref[...], be1_ref[...])

    # --- layer 2: Linear(concat[h1, u]) + ReLU + LayerNorm ------------------
    # concat([h1, u], 1) @ W2  ==  h1 @ W2x + u @ W2u
    h2 = (jnp.dot(h1.astype(jnp.bfloat16), w2x_ref[...],
                  preferred_element_type=jnp.float32)
          + jnp.dot(u, w2u_ref[...], preferred_element_type=jnp.float32)
          + b2_ref[...])
    h2 = jnp.maximum(h2, 0.0)
    h2 = _layernorm(h2, g2_ref[...], be2_ref[...])

    # --- layer 3: Linear(64 -> 1) as VPU multiply + XLU lane reduce ---------
    out = jnp.sum(h2 * w3_ref[...], axis=-1, keepdims=True) + b3_ref[...]
    out_ref[...] = out.astype(out_ref.dtype)


def _default_tile_b():
    """Per-generation batch tile: bigger on 128 MiB VMEM parts, smaller on v7x."""
    try:
        vmem_bytes = pltpu.get_tpu_info().vmem_capacity_bytes
    except Exception:
        vmem_bytes = 64 << 20                 # conservative (v7x-sized)
    # 128 MiB parts (v5e/v6e): 16K rows; 64 MiB (v7x): 8K rows.
    # Per-tile footprint stays well under the default 32 MiB scoped VMEM limit.
    return 16384 if vmem_bytes >= (100 << 20) else 8192


def critic_forward(x, u, params, tile_b=None):
    B, state_dim = x.shape
    action_dim = u.shape[1]

    if tile_b is None:
        tile_b = _default_tile_b()
    tile_b = min(tile_b, _round_up(B, 8))     # small batches: a single tile
    b_pad = _round_up(B, tile_b)
    if b_pad != B:
        x = jnp.pad(x, ((0, b_pad - B), (0, 0)))
        u = jnp.pad(u, ((0, b_pad - B), (0, 0)))
    x = x.astype(jnp.bfloat16)
    u = u.astype(jnp.bfloat16)

    grid = (b_pad // tile_b,)

    def batch_spec(feat):
        return pl.BlockSpec((tile_b, feat), lambda i: (i, 0))

    def const_spec(arr):
        # Constant block index -> Pallas keeps these VMEM-resident across steps.
        return pl.BlockSpec(arr.shape, lambda i: (0, 0))

    weights = (params["w1"], params["b1"], params["g1"], params["be1"],
               params["w2x"], params["w2u"], params["b2"], params["g2"],
               params["be2"], params["w3"], params["b3"])

    out = pl.pallas_call(
        critic_kernel,
        out_shape=jax.ShapeDtypeStruct((b_pad, 1), jnp.float32),
        grid=grid,
        in_specs=[batch_spec(state_dim), batch_spec(action_dim)]
                 + [const_spec(w) for w in weights],
        out_specs=pl.BlockSpec((tile_b, 1), lambda i: (i, 0)),
        compiler_params=pltpu.CompilerParams(
            dimension_semantics=("parallel",)),
    )(x, u, *weights)
    return out[:B]


def init_params(key, state_dim, action_dim, hidden=HIDDEN):
    """Deterministic init mimicking PyTorch Linear default (uniform +-1/sqrt(fan_in))."""
    ks = jax.random.split(key, 3)

    def linear(k, fan_in, fan_out):
        bound = 1.0 / jnp.sqrt(fan_in)
        kw, kb = jax.random.split(k)
        w = jax.random.uniform(kw, (fan_in, fan_out), jnp.float32, -bound, bound)
        b = jax.random.uniform(kb, (1, fan_out), jnp.float32, -bound, bound)
        return w, b

    w1, b1 = linear(ks[0], state_dim, hidden)
    w2, b2 = linear(ks[1], hidden + action_dim, hidden)
    w3, b3 = linear(ks[2], hidden, 1)

    return {
        # MXU operands stored bf16 (accumulation stays f32 in-kernel).
        "w1": w1.astype(jnp.bfloat16), "b1": b1,
        "g1": jnp.ones((1, hidden), jnp.float32),
        "be1": jnp.zeros((1, hidden), jnp.float32),
        # split W2 rows: first `hidden` rows multiply h1, the rest multiply u
        "w2x": w2[:hidden, :].astype(jnp.bfloat16),
        "w2u": w2[hidden:, :].astype(jnp.bfloat16),
        "b2": b2,
        "g2": jnp.ones((1, hidden), jnp.float32),
        "be2": jnp.zeros((1, hidden), jnp.float32),
        # 64 -> 1 head kept f32 as a (1, 64) row for the VPU multiply + reduce.
        "w3": w3.T, "b3": b3,
    }


def critic_reference(x, u, p):
    """Plain-JAX reference mirroring the kernel's numerics (bf16 dots, f32 LN)."""
    xb = x.astype(jnp.bfloat16)
    ub = u.astype(jnp.bfloat16)
    h1 = jnp.dot(xb, p["w1"], preferred_element_type=jnp.float32) + p["b1"]
    h1 = _layernorm(jnp.maximum(h1, 0.0), p["g1"], p["be1"])
    h2 = (jnp.dot(h1.astype(jnp.bfloat16), p["w2x"],
                  preferred_element_type=jnp.float32)
          + jnp.dot(ub, p["w2u"], preferred_element_type=jnp.float32)
          + p["b2"])
    h2 = _layernorm(jnp.maximum(h2, 0.0), p["g2"], p["be2"])
    return jnp.sum(h2 * p["w3"], axis=-1, keepdims=True) + p["b3"]


def critic_reference_f32(x, u, p):
    """Full-f32 reference with PyTorch forward semantics (looser sanity check)."""
    h1 = jnp.maximum(x @ p["w1"].astype(jnp.float32) + p["b1"], 0.0)
    h1 = _layernorm(h1, p["g1"], p["be1"])
    h2 = jnp.maximum(h1 @ p["w2x"].astype(jnp.float32)
                     + u @ p["w2u"].astype(jnp.float32) + p["b2"], 0.0)
    h2 = _layernorm(h2, p["g2"], p["be2"])
    return jnp.sum(h2 * p["w3"], axis=-1, keepdims=True) + p["b3"]


if __name__ == "__main__":
    B, state_dim, action_dim = 8, 16, 4

    key = jax.random.PRNGKey(0)
    kx, ku, kp = jax.random.split(key, 3)
    x = jax.random.normal(kx, (B, state_dim), jnp.float32)
    u = jax.random.normal(ku, (B, action_dim), jnp.float32)
    params = init_params(kp, state_dim, action_dim)

    out = critic_forward(x, u, params)
    out = jax.block_until_ready(out)
    assert out.shape == (B, 1), out.shape

    # Tight check vs a reference that mirrors the kernel's bf16/f32 numerics.
    ref = critic_reference(x, u, params)
    assert jnp.allclose(out, ref, atol=1e-3, rtol=1e-3), (out, ref)

    # Looser sanity check vs the full-f32 (PyTorch-semantics) forward.
    ref32 = critic_reference_f32(x, u, params)
    assert jnp.allclose(out, ref32, atol=1e-1, rtol=1e-1), (out, ref32)

    print("KERNEL_OK")
</pallas_src>

<mosaic_0001>
module attributes {stable_mosaic.version = 11 : i64} {
  func.func @critic_kernel(%arg0: i32, %arg1: memref<8x16xbf16, #tpu.memory_space<vmem>>, %arg2: memref<8x4xbf16, #tpu.memory_space<vmem>>, %arg3: memref<16x64xbf16, #tpu.memory_space<vmem>>, %arg4: memref<1x64xf32, #tpu.memory_space<vmem>>, %arg5: memref<1x64xf32, #tpu.memory_space<vmem>>, %arg6: memref<1x64xf32, #tpu.memory_space<vmem>>, %arg7: memref<64x64xbf16, #tpu.memory_space<vmem>>, %arg8: memref<4x64xbf16, #tpu.memory_space<vmem>>, %arg9: memref<1x64xf32, #tpu.memory_space<vmem>>, %arg10: memref<1x64xf32, #tpu.memory_space<vmem>>, %arg11: memref<1x64xf32, #tpu.memory_space<vmem>>, %arg12: memref<1x64xf32, #tpu.memory_space<vmem>>, %arg13: memref<1x1xf32, #tpu.memory_space<vmem>>, %arg14: memref<8x1xf32, #tpu.memory_space<vmem>>) attributes {dimension_semantics = [#tpu.dimension_semantics<parallel>], iteration_bounds = array<i64: 1>, scalar_prefetch = 0 : i64, scratch_operands = 0 : i64, tpu.core_type = #tpu.core_type<tc>, window_params = [{transform_indices = @transform_0, window_bounds = array<i64: 8, 16>}, {transform_indices = @transform_1, window_bounds = array<i64: 8, 4>}, {pipeline_mode = #tpu.pipeline_mode<synchronous>, transform_indices = @transform_2, window_bounds = array<i64: 16, 64>}, {pipeline_mode = #tpu.pipeline_mode<synchronous>, transform_indices = @transform_3, window_bounds = array<i64: 1, 64>}, {pipeline_mode = #tpu.pipeline_mode<synchronous>, transform_indices = @transform_4, window_bounds = array<i64: 1, 64>}, {pipeline_mode = #tpu.pipeline_mode<synchronous>, transform_indices = @transform_5, window_bounds = array<i64: 1, 64>}, {pipeline_mode = #tpu.pipeline_mode<synchronous>, transform_indices = @transform_6, window_bounds = array<i64: 64, 64>}, {pipeline_mode = #tpu.pipeline_mode<synchronous>, transform_indices = @transform_7, window_bounds = array<i64: 4, 64>}, {pipeline_mode = #tpu.pipeline_mode<synchronous>, transform_indices = @transform_8, window_bounds = array<i64: 1, 64>}, {pipeline_mode = #tpu.pipeline_mode<synchronous>, transform_indices = @transform_9, window_bounds = array<i64: 1, 64>}, {pipeline_mode = #tpu.pipeline_mode<synchronous>, transform_indices = @transform_10, window_bounds = array<i64: 1, 64>}, {pipeline_mode = #tpu.pipeline_mode<synchronous>, transform_indices = @transform_11, window_bounds = array<i64: 1, 64>}, {pipeline_mode = #tpu.pipeline_mode<synchronous>, transform_indices = @transform_12, window_bounds = array<i64: 1, 1>}, {transform_indices = @transform_13, window_bounds = array<i64: 8, 1>}]} {
    %c0 = arith.constant 0 : index
    %c0_0 = arith.constant 0 : index
    %0 = vector.load %arg1[%c0, %c0_0] : memref<8x16xbf16, #tpu.memory_space<vmem>>, vector<8x16xbf16>
    %c0_1 = arith.constant 0 : index
    %c0_2 = arith.constant 0 : index
    %1 = vector.load %arg2[%c0_1, %c0_2] : memref<8x4xbf16, #tpu.memory_space<vmem>>, vector<8x4xbf16>
    %c0_3 = arith.constant 0 : index
    %c0_4 = arith.constant 0 : index
    %2 = vector.load %arg3[%c0_3, %c0_4] : memref<16x64xbf16, #tpu.memory_space<vmem>>, vector<16x64xbf16>
    %cst = arith.constant dense<0.000000e+00> : vector<8x64xf32>
    %3 = tpu.matmul %0, %2, %cst {dimension_numbers = #tpu.dot_dimension_numbers<[1], [0], [0], [1], [0, 0, 1, 1], [], []>} : vector<8x16xbf16>, vector<16x64xbf16>, vector<8x64xf32> -> vector<8x64xf32>
    %c0_5 = arith.constant 0 : index
    %c0_6 = arith.constant 0 : index
    %4 = vector.load %arg4[%c0_5, %c0_6] : memref<1x64xf32, #tpu.memory_space<vmem>>, vector<1x64xf32>
    %5 = vector.broadcast %4 : vector<1x64xf32> to vector<8x64xf32>
    %6 = arith.addf %3, %5 : vector<8x64xf32>
    %cst_7 = arith.constant 0.000000e+00 : f32
    %7 = vector.broadcast %cst_7 : f32 to vector<8x64xf32>
    %8 = arith.maximumf %6, %7 : vector<8x64xf32>
    %c0_8 = arith.constant 0 : index
    %c0_9 = arith.constant 0 : index
    %9 = vector.load %arg5[%c0_8, %c0_9] : memref<1x64xf32, #tpu.memory_space<vmem>>, vector<1x64xf32>
    %c0_10 = arith.constant 0 : index
    %c0_11 = arith.constant 0 : index
    %10 = vector.load %arg6[%c0_10, %c0_11] : memref<1x64xf32, #tpu.memory_space<vmem>>, vector<1x64xf32>
    %cst_12 = arith.constant dense<0.000000e+00> : vector<8xf32>
    %11 = vector.multi_reduction <add>, %8, %cst_12 [1] : vector<8x64xf32> to vector<8xf32>
    %12 = vector.shape_cast %11 : vector<8xf32> to vector<8x1xf32>
    %cst_13 = arith.constant 6.400000e+01 : f32
    %13 = vector.broadcast %cst_13 : f32 to vector<8x1xf32>
    %14 = arith.divf %12, %13 : vector<8x1xf32>
    %15 = arith.mulf %8, %8 : vector<8x64xf32>
    %cst_14 = arith.constant dense<0.000000e+00> : vector<8xf32>
    %16 = vector.multi_reduction <add>, %15, %cst_14 [1] : vector<8x64xf32> to vector<8xf32>
    %17 = vector.shape_cast %16 : vector<8xf32> to vector<8x1xf32>
    %cst_15 = arith.constant 6.400000e+01 : f32
    %18 = vector.broadcast %cst_15 : f32 to vector<8x1xf32>
    %19 = arith.divf %17, %18 : vector<8x1xf32>
    %20 = arith.mulf %14, %14 : vector<8x1xf32>
    %21 = arith.subf %19, %20 : vector<8x1xf32>
    %cst_16 = arith.constant 0.000000e+00 : f32
    %22 = vector.broadcast %cst_16 : f32 to vector<8x1xf32>
    %23 = arith.maximumf %21, %22 : vector<8x1xf32>
    %24 = vector.broadcast %14 : vector<8x1xf32> to vector<8x64xf32>
    %25 = arith.subf %8, %24 : vector<8x64xf32>
    %cst_17 = arith.constant 9.99999974E-6 : f32
    %26 = vector.broadcast %cst_17 : f32 to vector<8x1xf32>
    %27 = arith.addf %23, %26 : vector<8x1xf32>
    %28 = math.rsqrt %27 : vector<8x1xf32>
    %29 = vector.broadcast %28 : vector<8x1xf32> to vector<8x64xf32>
    %30 = arith.mulf %25, %29 : vector<8x64xf32>
    %31 = vector.broadcast %9 : vector<1x64xf32> to vector<8x64xf32>
    %32 = arith.mulf %30, %31 : vector<8x64xf32>
    %33 = vector.broadcast %10 : vector<1x64xf32> to vector<8x64xf32>
    %34 = arith.addf %32, %33 : vector<8x64xf32>
    %35 = arith.truncf %34 : vector<8x64xf32> to vector<8x64xbf16>
    %c0_18 = arith.constant 0 : index
    %c0_19 = arith.constant 0 : index
    %36 = vector.load %arg7[%c0_18, %c0_19] : memref<64x64xbf16, #tpu.memory_space<vmem>>, vector<64x64xbf16>
    %cst_20 = arith.constant dense<0.000000e+00> : vector<8x64xf32>
    %37 = tpu.matmul %35, %36, %cst_20 {dimension_numbers = #tpu.dot_dimension_numbers<[1], [0], [0], [1], [0, 0, 1, 1], [], []>} : vector<8x64xbf16>, vector<64x64xbf16>, vector<8x64xf32> -> vector<8x64xf32>
    %c0_21 = arith.constant 0 : index
    %c0_22 = arith.constant 0 : index
    %38 = vector.load %arg8[%c0_21, %c0_22] : memref<4x64xbf16, #tpu.memory_space<vmem>>, vector<4x64xbf16>
    %cst_23 = arith.constant dense<0.000000e+00> : vector<8x64xf32>
    %39 = tpu.matmul %1, %38, %cst_23 {dimension_numbers = #tpu.dot_dimension_numbers<[1], [0], [0], [1], [0, 0, 1, 1], [], []>} : vector<8x4xbf16>, vector<4x64xbf16>, vector<8x64xf32> -> vector<8x64xf32>
    %40 = arith.addf %37, %39 : vector<8x64xf32>
    %c0_24 = arith.constant 0 : index
    %c0_25 = arith.constant 0 : index
    %41 = vector.load %arg9[%c0_24, %c0_25] : memref<1x64xf32, #tpu.memory_space<vmem>>, vector<1x64xf32>
    %42 = vector.broadcast %41 : vector<1x64xf32> to vector<8x64xf32>
    %43 = arith.addf %40, %42 : vector<8x64xf32>
    %cst_26 = arith.constant 0.000000e+00 : f32
    %44 = vector.broadcast %cst_26 : f32 to vector<8x64xf32>
    %45 = arith.maximumf %43, %44 : vector<8x64xf32>
    %c0_27 = arith.constant 0 : index
    %c0_28 = arith.constant 0 : index
    %46 = vector.load %arg10[%c0_27, %c0_28] : memref<1x64xf32, #tpu.memory_space<vmem>>, vector<1x64xf32>
    %c0_29 = arith.constant 0 : index
    %c0_30 = arith.constant 0 : index
    %47 = vector.load %arg11[%c0_29, %c0_30] : memref<1x64xf32, #tpu.memory_space<vmem>>, vector<1x64xf32>
    %cst_31 = arith.constant dense<0.000000e+00> : vector<8xf32>
    %48 = vector.multi_reduction <add>, %45, %cst_31 [1] : vector<8x64xf32> to vector<8xf32>
    %49 = vector.shape_cast %48 : vector<8xf32> to vector<8x1xf32>
    %cst_32 = arith.constant 6.400000e+01 : f32
    %50 = vector.broadcast %cst_32 : f32 to vector<8x1xf32>
    %51 = arith.divf %49, %50 : vector<8x1xf32>
    %52 = arith.mulf %45, %45 : vector<8x64xf32>
    %cst_33 = arith.constant dense<0.000000e+00> : vector<8xf32>
    %53 = vector.multi_reduction <add>, %52, %cst_33 [1] : vector<8x64xf32> to vector<8xf32>
    %54 = vector.shape_cast %53 : vector<8xf32> to vector<8x1xf32>
    %cst_34 = arith.constant 6.400000e+01 : f32
    %55 = vector.broadcast %cst_34 : f32 to vector<8x1xf32>
    %56 = arith.divf %54, %55 : vector<8x1xf32>
    %57 = arith.mulf %51, %51 : vector<8x1xf32>
    %58 = arith.subf %56, %57 : vector<8x1xf32>
    %cst_35 = arith.constant 0.000000e+00 : f32
    %59 = vector.broadcast %cst_35 : f32 to vector<8x1xf32>
    %60 = arith.maximumf %58, %59 : vector<8x1xf32>
    %61 = vector.broadcast %51 : vector<8x1xf32> to vector<8x64xf32>
    %62 = arith.subf %45, %61 : vector<8x64xf32>
    %cst_36 = arith.constant 9.99999974E-6 : f32
    %63 = vector.broadcast %cst_36 : f32 to vector<8x1xf32>
    %64 = arith.addf %60, %63 : vector<8x1xf32>
    %65 = math.rsqrt %64 : vector<8x1xf32>
    %66 = vector.broadcast %65 : vector<8x1xf32> to vector<8x64xf32>
    %67 = arith.mulf %62, %66 : vector<8x64xf32>
    %68 = vector.broadcast %46 : vector<1x64xf32> to vector<8x64xf32>
    %69 = arith.mulf %67, %68 : vector<8x64xf32>
    %70 = vector.broadcast %47 : vector<1x64xf32> to vector<8x64xf32>
    %71 = arith.addf %69, %70 : vector<8x64xf32>
    %c0_37 = arith.constant 0 : index
    %c0_38 = arith.constant 0 : index
    %72 = vector.load %arg12[%c0_37, %c0_38] : memref<1x64xf32, #tpu.memory_space<vmem>>, vector<1x64xf32>
    %73 = vector.broadcast %72 : vector<1x64xf32> to vector<8x64xf32>
    %74 = arith.mulf %71, %73 : vector<8x64xf32>
    %cst_39 = arith.constant dense<0.000000e+00> : vector<8xf32>
    %75 = vector.multi_reduction <add>, %74, %cst_39 [1] : vector<8x64xf32> to vector<8xf32>
    %76 = vector.shape_cast %75 : vector<8xf32> to vector<8x1xf32>
    %c0_40 = arith.constant 0 : index
    %c0_41 = arith.constant 0 : index
    %77 = vector.load %arg13[%c0_40, %c0_41] : memref<1x1xf32, #tpu.memory_space<vmem>>, vector<1x1xf32>
    %78 = vector.broadcast %77 : vector<1x1xf32> to vector<8x1xf32>
    %79 = arith.addf %76, %78 : vector<8x1xf32>
    %c0_42 = arith.constant 0 : index
    %c0_43 = arith.constant 0 : index
    %80 = vector.load %arg14[%c0_42, %c0_43] : memref<8x1xf32, #tpu.memory_space<vmem>>, vector<8x1xf32>
    tpu.vector_store %arg14[%c0_42, %c0_43], %79 {strides = array<i32>} : memref<8x1xf32, #tpu.memory_space<vmem>>, vector<8x1xf32>,
    return
  }
  func.func @transform_0(%arg0: i32) -> (i32, i32) {
    %c0_i32 = arith.constant 0 : i32
    %c0_i32_0 = arith.constant 0 : i32
    return %arg0, %c0_i32 : i32, i32
  }
  func.func @transform_1(%arg0: i32) -> (i32, i32) {
    %c0_i32 = arith.constant 0 : i32
    %c0_i32_0 = arith.constant 0 : i32
    return %arg0, %c0_i32 : i32, i32
  }
  func.func @transform_2(%arg0: i32) -> (i32, i32) {
    %c0_i32 = arith.constant 0 : i32
    %c0_i32_0 = arith.constant 0 : i32
    %c0_i32_1 = arith.constant 0 : i32
    return %c0_i32, %c0_i32_0 : i32, i32
  }
  func.func @transform_3(%arg0: i32) -> (i32, i32) {
    %c0_i32 = arith.constant 0 : i32
    %c0_i32_0 = arith.constant 0 : i32
    %c0_i32_1 = arith.constant 0 : i32
    return %c0_i32, %c0_i32_0 : i32, i32
  }
  func.func @transform_4(%arg0: i32) -> (i32, i32) {
    %c0_i32 = arith.constant 0 : i32
    %c0_i32_0 = arith.constant 0 : i32
    %c0_i32_1 = arith.constant 0 : i32
    return %c0_i32, %c0_i32_0 : i32, i32
  }
  func.func @transform_5(%arg0: i32) -> (i32, i32) {
    %c0_i32 = arith.constant 0 : i32
    %c0_i32_0 = arith.constant 0 : i32
    %c0_i32_1 = arith.constant 0 : i32
    return %c0_i32, %c0_i32_0 : i32, i32
  }
  func.func @transform_6(%arg0: i32) -> (i32, i32) {
    %c0_i32 = arith.constant 0 : i32
    %c0_i32_0 = arith.constant 0 : i32
    %c0_i32_1 = arith.constant 0 : i32
    return %c0_i32, %c0_i32_0 : i32, i32
  }
  func.func @transform_7(%arg0: i32) -> (i32, i32) {
    %c0_i32 = arith.constant 0 : i32
    %c0_i32_0 = arith.constant 0 : i32
    %c0_i32_1 = arith.constant 0 : i32
    return %c0_i32, %c0_i32_0 : i32, i32
  }
  func.func @transform_8(%arg0: i32) -> (i32, i32) {
    %c0_i32 = arith.constant 0 : i32
    %c0_i32_0 = arith.constant 0 : i32
    %c0_i32_1 = arith.constant 0 : i32
    return %c0_i32, %c0_i32_0 : i32, i32
  }
  func.func @transform_9(%arg0: i32) -> (i32, i32) {
    %c0_i32 = arith.constant 0 : i32
    %c0_i32_0 = arith.constant 0 : i32
    %c0_i32_1 = arith.constant 0 : i32
    return %c0_i32, %c0_i32_0 : i32, i32
  }
  func.func @transform_10(%arg0: i32) -> (i32, i32) {
    %c0_i32 = arith.constant 0 : i32
    %c0_i32_0 = arith.constant 0 : i32
    %c0_i32_1 = arith.constant 0 : i32
    return %c0_i32, %c0_i32_0 : i32, i32
  }
  func.func @transform_11(%arg0: i32) -> (i32, i32) {
    %c0_i32 = arith.constant 0 : i32
    %c0_i32_0 = arith.constant 0 : i32
    %c0_i32_1 = arith.constant 0 : i32
    return %c0_i32, %c0_i32_0 : i32, i32
  }
  func.func @transform_12(%arg0: i32) -> (i32, i32) {
    %c0_i32 = arith.constant 0 : i32
    %c0_i32_0 = arith.constant 0 : i32
    %c0_i32_1 = arith.constant 0 : i32
    return %c0_i32, %c0_i32_0 : i32, i32
  }
  func.func @transform_13(%arg0: i32) -> (i32, i32) {
    %c0_i32 = arith.constant 0 : i32
    %c0_i32_0 = arith.constant 0 : i32
    return %arg0, %c0_i32 : i32, i32
  }
}

</mosaic_0001>

<bundles_post_ra>
// kernel: tpu_custom_call.1
= control target key start
LH: loop header
LB: loop body
LE: loop exit
PB: predicated region body
PF: predicated region fallthrough
CT: control target
= control target key end

     0   :  { %s594_s0 = inlined_call_operand.hbm [shape: bf16[8,16], index: 0, kind: input, shape index: {}]   ;;  %s595_s1 = inlined_call_operand.vmem [shape: bf16[8,4], index: 1, kind: input, shape index: {}]   ;;  %s596_s2 = inlined_call_operand.vmem [shape: bf16[16,64], index: 2, kind: input, shape index: {}]   ;;  %s597_s3 = inlined_call_operand.vmem [shape: f32[1,64], index: 3, kind: input, shape index: {}]   ;;  %s598_s4 = inlined_call_operand.vmem [shape: f32[1,64], index: 4, kind: input, shape index: {}]   ;;  %s599_s5 = inlined_call_operand.vmem [shape: f32[1,64], index: 5, kind: input, shape index: {}]   ;;  %s600_s6 = inlined_call_operand.hbm [shape: bf16[64,64], index: 6, kind: input, shape index: {}]   ;;  %s601_s7 = inlined_call_operand.vmem [shape: bf16[4,64], index: 7, kind: input, shape index: {}]   ;;  %s602_s8 = inlined_call_operand.vmem [shape: f32[1,64], index: 8, kind: input, shape index: {}]   ;;  %s603_s9 = inlined_call_operand.vmem [shape: f32[1,64], index: 9, kind: input, shape index: {}]   ;;  %s604_s10 = inlined_call_operand.vmem [shape: f32[1,64], index: 10, kind: input, shape index: {}]   ;;  %s605_s11 = inlined_call_operand.vmem [shape: f32[1,64], index: 11, kind: input, shape index: {}]   ;;  %s606_s12 = inlined_call_operand.<no memory space> [shape: f32[1,1], index: 12, kind: input, shape index: {}]   ;;  %s607_s13 = inlined_call_operand.vmem [shape: f32[8,1], index: 13, kind: output, shape index: {}]  }
   0x1   :  { %v18_v0 = vstv %s606_s12 }
   0x2   :  { %19 = vst [vmem:[#allocation2] sm:$0x1] %v18_v0 }
   0x3   :  { %20 = vsyncpa [#allocation4], 0 }
   0x4   :  { %21 = vsyncpa [#allocation6], 0  ;;  %s470_s27 = smov [#allocation3]   ;;  %s471_s29 = smov [#allocation5]  }
   0x5   :  { %s28_s28 = sshll.u32 %s470_s27, 4  ;;  %s47_s30 = sshll.u32 %s471_s29, 4  ;;  %s29_s28 = int_to_ptr.vmem [resolvable:$true] %s28_s28  ;;  %s48_s30 = int_to_ptr.vmem [resolvable:$true] %s47_s30 }
   0x6   :  { %s434_s14 = scalar_lea.vmem %s29_s28, 64  ;;  %p439_p1 = scmp.lt.s32.totalorder %s29_s28, %s29_s28 }
   0x7   :  { %p435_p0 = scmp.ne.s32.totalorder %s29_s28, %s434_s14  ;;  %p440_p2 = scmp.lt.s32.totalorder %s434_s14, %s434_s14 }
   0x9   :  { %p441_p3 = por %p440_p2, %p439_p1 }
   0xb   :  { %p442_p4 = pnand %p441_p3, %p435_p0 }
   0xd   :  { %445 = shalt.err (!%p442_p4)
}
   0xe   :  { %31 = dma.hbm_to_vmem [thread:$0]  %s594_s0, 64, %s29_s28, [#allocation4]  }
   0xf   :  { %s454_s12 = scalar_lea.vmem %s48_s30, 512  ;;  %p459_p6 = scmp.lt.s32.totalorder %s48_s30, %s48_s30 }
  0x10   :  { %p455_p5 = scmp.ne.s32.totalorder %s48_s30, %s454_s12  ;;  %p460_p7 = scmp.lt.s32.totalorder %s454_s12, %s454_s12 }
  0x12   :  { %p461_p8 = por %p460_p7, %p459_p6 }
  0x14   :  { %p462_p9 = pnand %p461_p8, %p455_p5 }
  0x16   :  { %465 = shalt.err (!%p462_p9)
}
  0x17   :  { %s472_s17 = smov 64   ;;  %s473_s18 = smov 4  }
  0x18   :  { %53 = dma.hbm_to_vmem [thread:$0]  %s600_s6, 512, %s48_s30, [#allocation6], %s472_s17, %s472_s17, %s473_s18  }
  0x19   :  { %466 = dma.done.wait [#allocation4], 64  }
  0x1a   :  { %467 = vsyncadd [#allocation4], 4294967232 }
  0x1b   :  { %468 = dma.done.wait [#allocation6], 512  }
  0x1c   :  { %469 = vsyncadd [#allocation6], 4294966784  ;;  %v474_v1 = vmov 0.0   ;;  %vm475_vm0 = vmmov 0   ;;  %v417_v2 = vld [vmem:[%s596_s2] sm:$0xff]   ;;  %vm90_vm1 = vcmask 130048  }
  0x1d   :  { %387 = vmatprep.subr.bf16.mxu1 %v474_v1  ;;  %389 = vmatprep.mubr.msk.bf16.mxu1 %vm475_vm0, %v474_v1  ;;  %v73_v3 = vld [vmem:[#allocation3] sm:$0xf]  ;;  %v362_v4 = vld [vmem:[%s597_s3] ss:$0 sm:$0xff]  ;;  %vm137_vm2 = vcmask 523264   ;;  %vm183_vm3 = vcmask 1041408  }
  0x1e   :  { %399 = vmatprep.subr.bf16.mxu0 %v474_v1  ;;  %407 = vmatprep.mubr.msk.bf16.mxu0 %vm475_vm0, %v474_v1  ;;  %v418_v14 = vld [vmem:[#allocation5 + $0x18] sm:$0xff]   ;;  %v419_v17 = vld [vmem:[#allocation5 + $0x10] sm:$0xff]   ;;  %vm179_vm4 = vcmask 31744   ;;  %v420_v19 = vld [vmem:[#allocation5 + $0x8] sm:$0xff]   ;;  %vm354_vm5 = vcmask 7168  }
  0x1f   :  { %388 = vmatpush3.bf16.msra.mxu1 %v417_v2  ;;  %v178_v15 = vld [vmem:[%s601_s7] sm:$0x3]  ;;  %400 = vmatpush3.bf16.msra.mxu0 %v418_v14  ;;  %v421_v20 = vld [vmem:[#allocation5] sm:$0xff]  }
  0x20   :  { %393 = vmatprep.subr.bf16.mxu1 %v474_v1  ;;  %v185_v16 = vsel %vm183_vm3, %v178_v15, 0  ;;  %v74_v18 = vld [vmem:[%s595_s1] sm:$0xf]  ;;  %401 = vmatprep.subr.bf16.mxu0 %v474_v1 }
  0x21   :  { %v365_v31 = vld [vmem:[%s598_s4] ss:$0 sm:$0xff] }
  0x22   :  { %390 = vmatmul.mubr.msk.bf16.vlgmr.msra.gmra.mxu1 %vm90_vm1, %v73_v3  ;;  %v366_v33 = vld [vmem:[%s599_s5] ss:$0 sm:$0xff] }
  0x23   :  { %395 = vmatprep.mubr.msk.bf16.mxu1 %vm475_vm0, %v474_v1  ;;  %394 = vmatpush3.bf16.msra.mxu1 %v185_v16  ;;  %v373_v42 = vld [vmem:[%s602_s8] ss:$0 sm:$0xff] }
  0x24   :  { %402 = vmatpush3.bf16.msra.mxu0 %v419_v17  ;;  %v374_v62 = vld [vmem:[%s603_s9] ss:$0 sm:$0xff] }
  0x25   :  { %403 = vmatprep.subr.bf16.mxu0 %v474_v1  ;;  %v375_v0 = vld [vmem:[%s604_s10] ss:$0 sm:$0xff] }
  0x26   :  { %v376_v2 = vld [vmem:[%s605_s11] ss:$0 sm:$0xff] }
  0x28   :  { %404 = vmatpush3.bf16.msra.mxu0 %v420_v19 }
  0x29   :  { %405 = vmatprep.subr.bf16.mxu0 %v474_v1 }
  0x2a   :  { %396 = vmatmul.mubr.msk.bf16.vlgmr.msra.gmra.mxu1 %vm179_vm4, %v74_v18 }
  0x2c   :  { %406 = vmatpush3.bf16.msra.mxu0 %v421_v20 }
  0xe2   :  { %v128_v5 = vpop.f32.mrf.mxu1 }
  0xe3   :  { %v129_v6 = vadd.f32 %v362_v4, %v128_v5 }
  0xe4   :  { %v391_v7 = vpop.f32.mrf.mxu1 }
  0xe5   :  { %v134_v8 = vmax.f32 %v129_v6, 0.0  ;;  %v377_v6 = vld [vmem:[#allocation2] ss:$0 sm:$0xff] }
  0xe6   :  { %v131_v9 = vpop.f32.mrf.mxu1 }
  0xe7   :  { %v138_v10 = vsel %vm137_vm2, %v134_v8, 0.0  ;;  %v143_v11 = vmul.f32 %v134_v8, %v134_v8 }
  0xe8   :  { %139 = vadd.xlane.f32.xlu0 %v138_v10  ;;  %v392_v12 = vpop.f32.mrf.mxu1 }
  0xe9   :  { %v144_v13 = vsel %vm137_vm2, %v143_v11, 0.0 }
  0xea   :  { %v221_v37 = vpop.f32.mrf.mxu1 }
  0xec   :  { %145 = vadd.xlane.f32.xlu0 %v144_v13  ;;  %v397_v38 = vpop.f32.mrf.mxu1 }
  0xee   :  { %v224_v39 = vpop.f32.mrf.mxu1 }
  0xf0   :  { %v398_v40 = vpop.f32.mrf.mxu1 }
 0x171   :  { %v140_v21 = vpop.xlane.xlu0 %139 }
 0x172   :  { %v142_v22 = vmul.f32 0.015625, %v140_v21 }
 0x174   :  { %v148_v24 = vmul.f32 %v142_v22, %v142_v22  ;;  %v151_v29 = vsub.f32 %v134_v8, %v142_v22 }
 0x175   :  { %v146_v23 = vpop.xlane.xlu0 %145 }
 0x176   :  { %v147_v25 = vmul.f32 0.015625, %v146_v23 }
 0x178   :  { %v149_v26 = vsub.f32 %v147_v25, %v148_v24 }
 0x17a   :  { %v150_v27 = vmax.f32 %v149_v26, 0.0 }
 0x17c   :  { %v152_v28 = vadd.f32 1e-05, %v150_v27 }
 0x17e   :  { %422 = vrsqrt.f32 %v152_v28 }
 0x18b   :  { %v423_v30 = vpop.eup %422 }
 0x18c   :  { %v154_v32 = vmul.f32 %v423_v30, %v151_v29 }
 0x18e   :  { %v161_v34 = vmul.f32 %v365_v31, %v154_v32 }
 0x190   :  { %v168_v35 = vadd.f32 %v366_v33, %v161_v34 }
 0x192   :  { %v169_v36 = vpack.c.bf16 %v168_v35, %v168_v35 }
 0x194   :  { %408 = vmatmul.mubr.msk.bf16.vlgmr.msra.gmra.mxu0 %vm137_vm2, %v169_v36 }
 0x254   :  { %v288_v41 = vpop.f32.mrf.mxu0 }
 0x255   :  { %v289_v43 = vadd.f32 %v288_v41, %v221_v37 }
 0x256   :  { %v409_v44 = vpop.f32.mrf.mxu0 }
 0x257   :  { %v301_v45 = vadd.f32 %v373_v42, %v289_v43 }
 0x258   :  { %v291_v46 = vpop.f32.mrf.mxu0 }
 0x259   :  { %v302_v47 = vmax.f32 %v301_v45, 0.0 }
 0x25a   :  { %v410_v48 = vpop.f32.mrf.mxu0 }
 0x25b   :  { %v305_v49 = vsel %vm137_vm2, %v302_v47, 0.0  ;;  %v309_v50 = vmul.f32 %v302_v47, %v302_v47 }
 0x25c   :  { %306 = vadd.xlane.f32.xlu1 %v305_v49 }
 0x25d   :  { %v310_v51 = vsel %vm137_vm2, %v309_v50, 0.0 }
 0x260   :  { %311 = vadd.xlane.f32.xlu1 %v310_v51 }
 0x2e5   :  { %v307_v52 = vpop.xlane.xlu1 %306 }
 0x2e6   :  { %v308_v53 = vmul.f32 0.015625, %v307_v52 }
 0x2e8   :  { %v314_v55 = vmul.f32 %v308_v53, %v308_v53  ;;  %v317_v60 = vsub.f32 %v302_v47, %v308_v53 }
 0x2e9   :  { %v312_v54 = vpop.xlane.xlu1 %311 }
 0x2ea   :  { %v313_v56 = vmul.f32 0.015625, %v312_v54 }
 0x2ec   :  { %v315_v57 = vsub.f32 %v313_v56, %v314_v55 }
 0x2ee   :  { %v316_v58 = vmax.f32 %v315_v57, 0.0 }
 0x2f0   :  { %v318_v59 = vadd.f32 1e-05, %v316_v58 }
 0x2f2   :  { %424 = vrsqrt.f32 %v318_v59 }
 0x2ff   :  { %v425_v61 = vpop.eup %424 }
 0x300   :  { %v320_v63 = vmul.f32 %v425_v61, %v317_v60 }
 0x302   :  { %v327_v1 = vmul.f32 %v374_v62, %v320_v63 }
 0x304   :  { %v334_v3 = vadd.f32 %v375_v0, %v327_v1 }
 0x306   :  { %v342_v4 = vmul.f32 %v376_v2, %v334_v3 }
 0x308   :  { %v343_v5 = vsel %vm137_vm2, %v342_v4, 0.0 }
 0x309   :  { %344 = vadd.xlane.f32.xlu0 %v343_v5 }
 0x392   :  { %v345_v7 = vpop.xlane.xlu0 %344 }
 0x393   :  { %v353_v8 = vadd.f32 %v377_v6, %v345_v7 }
 0x395   :  { %355 = vst.msk [vmem:[%s607_s13] sm:$0xff] %vm354_vm5, %v353_v8 }
 0x396   :  { %360 = vsyncpa [#allocation4], 1 }
 0x397   :  { %361 = vsyncpa [#allocation6], 1 }

</bundles_post_ra>
